<compile_context>
chip_gen: v6e
topology: v6e:2x2x1
jax: 0.10.0
libtpu: 0.0.40
codegen_flags: <defaults>
</compile_context>

<pallas_src>
import jax
import jax.numpy as jnp
from jax.experimental import pallas as pl
from jax.experimental.pallas import tpu as pltpu


def _round_up(x, m):
    return ((x + m - 1) // m) * m


# ---------------------------------------------------------------------------
# Kernel 1: one GraphConv layer (+ folded BN for layer 2) + ReLU, row-tiled.
# ---------------------------------------------------------------------------
def graphconv_kernel(a_ref, x_ref, w_ref, b_ref, o_ref):
    # a_ref: (TM, N_pad)   bf16 row slab of the dense weighted adjacency
    # x_ref: (N_pad, C_in) bf16 full node features (pinned across the grid)
    # w_ref: (2*C_in, C_out) bf16 stacked [W_rel; W_root]
    # b_ref: (1, C_out)    f32 bias (BN already folded in for layer 2)
    i = pl.program_id(0)
    tm = o_ref.shape[0]

    # Neighbourhood aggregation for this row tile: sum_j A[i, j] * x_j  (MXU, f32 acc).
    agg = jnp.dot(a_ref[...], x_ref[...], preferred_element_type=jnp.float32)

    # Root term: this tile's own features (slice the pinned full X).
    row0 = pl.multiple_of(i * tm, tm)
    x_tile = x_ref[pl.ds(row0, tm), :]

    # Single stacked matmul: [agg | x] @ [W_rel; W_root].
    z = jnp.concatenate([agg.astype(jnp.bfloat16), x_tile], axis=-1)
    h = jnp.dot(z, w_ref[...], preferred_element_type=jnp.float32) + b_ref[...]
    o_ref[...] = jnp.maximum(h, 0.0).astype(o_ref.dtype)


# ---------------------------------------------------------------------------
# Kernel 2: global_mean_pool (reduction over node tiles) + Linear/ReLU head.
# ---------------------------------------------------------------------------
def pool_head_kernel(p_ref, h_ref, wl1_ref, bl1_ref, wl2_ref, bl2_ref,
                     o_ref, acc_ref):
    # p_ref: (G_pad, TK) bf16 slice of mean-pool matrix; h_ref: (TK, 256) bf16.
    k = pl.program_id(0)

    @pl.when(k == 0)
    def _():
        acc_ref[...] = jnp.zeros_like(acc_ref)

    acc_ref[...] += jnp.dot(p_ref[...], h_ref[...],
                            preferred_element_type=jnp.float32)

    @pl.when(k == pl.num_programs(0) - 1)
    def _():
        g = acc_ref[...]  # (G_pad, 256) mean-pooled graph embeddings (f32)
        # TODO(synk): F.dropout is identity at inference; training-mode RNG mask
        # not implemented.
        g = jnp.dot(g.astype(jnp.bfloat16), wl1_ref[...],
                    preferred_element_type=jnp.float32) + bl1_ref[...]
        g = jnp.maximum(g, 0.0)
        # Final 64 -> 1 layer as a VPU/XLU reduction (avoids 1-column MXU matmul).
        out = jnp.sum(g * wl2_ref[...], axis=-1, keepdims=True) + bl2_ref[...]
        o_ref[...] = jnp.maximum(out, 0.0)


# ---------------------------------------------------------------------------
# pallas_call wrappers
# ---------------------------------------------------------------------------
def _vmem_limit(block_bytes):
    # Double-buffered block footprint + margin; clamp to a sane range.
    return int(min(max(2 * block_bytes + (4 << 20), 32 << 20), 100 << 20))


def _graphconv_layer(A, X, W, b, tm):
    n_pad = A.shape[0]
    c_in = X.shape[1]
    c_out = W.shape[1]
    grid = (n_pad // tm,)
    block_bytes = (tm * n_pad * 2 + n_pad * c_in * 2 + W.size * 2
                   + b.size * 4 + tm * c_out * 2)
    return pl.pallas_call(
        graphconv_kernel,
        out_shape=jax.ShapeDtypeStruct((n_pad, c_out), jnp.bfloat16),
        grid_spec=pltpu.PrefetchScalarGridSpec(
            num_scalar_prefetch=0,
            grid=grid,
            in_specs=[
                pl.BlockSpec((tm, n_pad), lambda i: (i, 0)),      # A row slab
                pl.BlockSpec((n_pad, c_in), lambda i: (0, 0)),    # full X (pinned)
                pl.BlockSpec((2 * c_in, c_out), lambda i: (0, 0)),  # stacked W
                pl.BlockSpec((1, c_out), lambda i: (0, 0)),       # bias
            ],
            out_specs=pl.BlockSpec((tm, c_out), lambda i: (i, 0)),
        ),
        compiler_params=pltpu.CompilerParams(
            dimension_semantics=("parallel",),
            vmem_limit_bytes=_vmem_limit(block_bytes)),
    )(A, X, W, b)


def _pool_head(P, H, wl1, bl1, wl2_row, bl2, tk):
    g_pad, n_pad = P.shape
    c = H.shape[1]
    grid = (n_pad // tk,)
    block_bytes = (g_pad * tk * 2 + tk * c * 2 + wl1.size * 2
                   + (bl1.size + wl2_row.size + bl2.size) * 4
                   + g_pad * 4 + g_pad * c * 4)
    return pl.pallas_call(
        pool_head_kernel,
        out_shape=jax.ShapeDtypeStruct((g_pad, 1), jnp.float32),
        grid_spec=pltpu.PrefetchScalarGridSpec(
            num_scalar_prefetch=0,
            grid=grid,
            in_specs=[
                pl.BlockSpec((g_pad, tk), lambda k: (0, k)),   # P column slab
                pl.BlockSpec((tk, c), lambda k: (k, 0)),       # H row slab
                pl.BlockSpec(wl1.shape, lambda k: (0, 0)),
                pl.BlockSpec(bl1.shape, lambda k: (0, 0)),
                pl.BlockSpec(wl2_row.shape, lambda k: (0, 0)),
                pl.BlockSpec(bl2.shape, lambda k: (0, 0)),
            ],
            out_specs=pl.BlockSpec((g_pad, 1), lambda k: (0, 0)),
            scratch_shapes=[pltpu.VMEM((g_pad, c), jnp.float32)],
        ),
        compiler_params=pltpu.CompilerParams(
            dimension_semantics=("arbitrary",),
            vmem_limit_bytes=_vmem_limit(block_bytes)),
    )(P, H, wl1, bl1, wl2_row, bl2)


# ---------------------------------------------------------------------------
# Forward pass (inference semantics: dropout=identity, BN uses running stats).
# ---------------------------------------------------------------------------
def gcnn_forward(x, edge_index, edge_attr, batch, params, num_graphs):
    """x: (N, F) f32, edge_index: (2, E) i32 [src; dst], edge_attr: (E,) f32,
    batch: (N,) i32 graph assignment. Returns (num_graphs, 1) f32."""
    N, F_in = x.shape
    f32, bf16 = jnp.float32, jnp.bfloat16

    # Node-dimension tiling.
    TM = 256
    n8 = _round_up(N, 8)
    if n8 <= TM:
        TM = n8
        N_pad = n8
    else:
        N_pad = _round_up(N, TM)
    F_pad = _round_up(F_in, 128)
    G_pad = _round_up(num_graphs, 8)

    # Dense weighted adjacency A[dst, src] = edge_weight (duplicates accumulate
    # in f32), then cast to bf16 once.
    # TODO(synk): for large sparse graphs replace with a block-sparse
    # scalar-prefetch formulation that skips all-zero (TM, TK) tiles of A.
    src, dst = edge_index[0], edge_index[1]
    A = jnp.zeros((N_pad, N_pad), f32).at[dst, src].add(
        edge_attr.astype(f32)).astype(bf16)

    # Mean-pool matrix (padded graphs / nodes are zero rows / columns).
    one_hot = (batch[None, :] == jnp.arange(num_graphs)[:, None]).astype(f32)
    counts = jnp.maximum(one_hot.sum(axis=1, keepdims=True), 1.0)
    P = jnp.zeros((G_pad, N_pad), f32).at[:num_graphs, :N].set(one_hot / counts)
    P = P.astype(bf16)

    # Padded input features.
    X0 = jnp.zeros((N_pad, F_pad), f32).at[:N, :F_in].set(
        x.astype(f32)).astype(bf16)

    # ---- fold / stack parameters -------------------------------------------
    def pad_rows(w, rows):
        return jnp.zeros((rows, w.shape[1]), f32).at[:w.shape[0]].set(w)

    w1 = jnp.concatenate([pad_rows(params["w1r"], F_pad),
                          pad_rows(params["w1s"], F_pad)], axis=0).astype(bf16)
    b1 = params["b1"].astype(f32)

    # BatchNorm1d folded into GraphConv-2 (inference: running statistics).
    scale = params["bn_gamma"] * jax.lax.rsqrt(params["bn_var"] + 1e-5)
    w2 = (jnp.concatenate([params["w2r"], params["w2s"]], axis=0)
          * scale).astype(bf16)
    b2 = ((params["b2"] - params["bn_mean"]) * scale
          + params["bn_beta"]).astype(f32)

    w3 = jnp.concatenate([params["w3r"], params["w3s"]], axis=0).astype(bf16)
    b3 = params["b3"].astype(f32)

    wl1 = params["wl1"].astype(bf16)
    bl1 = params["bl1"].astype(f32)
    wl2_row = params["wl2"].T.astype(f32)   # (1, 64)
    bl2 = params["bl2"].astype(f32)         # (1, 1)

    # ---- three GraphConv(+ReLU) layers, row-tiled ---------------------------
    h = _graphconv_layer(A, X0, w1, b1, TM)   # (N_pad, 512), conv1 + ReLU
    h = _graphconv_layer(A, h, w2, b2, TM)    # (N_pad, 512), conv2 + BN + ReLU
    h = _graphconv_layer(A, h, w3, b3, TM)    # (N_pad, 256), conv3 + ReLU

    # ---- global mean pool + dropout(identity) + Linear/ReLU head ------------
    out = _pool_head(P, h, wl1, bl1, wl2_row, bl2, TM)
    return out[:num_graphs]


# ---------------------------------------------------------------------------
# Parameter initialization (weights stored transposed: (in_features, out)).
# ---------------------------------------------------------------------------
def init_params(key, features_channels):
    ks = jax.random.split(key, 10)

    def w(k, shape, scale=0.1):
        return scale * jax.random.normal(k, shape, jnp.float32)

    F_in = features_channels
    return {
        # GraphConv(F_in, 512): lin_rel (with bias) and lin_root (no bias)
        "w1r": w(ks[0], (F_in, 512)), "w1s": w(ks[1], (F_in, 512)),
        "b1": jnp.zeros((1, 512), jnp.float32),
        # GraphConv(512, 512)
        "w2r": w(ks[2], (512, 512)), "w2s": w(ks[3], (512, 512)),
        "b2": jnp.zeros((1, 512), jnp.float32),
        # BatchNorm1d(512) defaults
        "bn_gamma": jnp.ones((1, 512), jnp.float32),
        "bn_beta": jnp.zeros((1, 512), jnp.float32),
        "bn_mean": jnp.zeros((1, 512), jnp.float32),
        "bn_var": jnp.ones((1, 512), jnp.float32),
        # GraphConv(512, 256)
        "w3r": w(ks[4], (512, 256)), "w3s": w(ks[5], (512, 256)),
        "b3": jnp.zeros((1, 256), jnp.float32),
        # Linear(256, 64)
        "wl1": w(ks[6], (256, 64)), "bl1": w(ks[7], (1, 64)),
        # Linear(64, 1)
        "wl2": w(ks[8], (64, 1)), "bl2": w(ks[9], (1, 1)),
    }


if __name__ == "__main__":
    key = jax.random.PRNGKey(0)
    k_param, k_x, k_e = jax.random.split(key, 3)

    N = 16            # nodes across the whole batch
    F_in = 8          # features_channels
    G = 2             # graphs in the batch
    params = init_params(k_param, F_in)

    x = jax.random.normal(k_x, (N, F_in), jnp.float32)
    # Bidirectional ring graph: E = 2 * N edges.
    nodes = jnp.arange(N, dtype=jnp.int32)
    nxt = jnp.roll(nodes, -1)
    edge_index = jnp.stack([jnp.concatenate([nodes, nxt]),
                            jnp.concatenate([nxt, nodes])], axis=0)  # (2, 32)
    edge_attr = jax.random.uniform(k_e, (2 * N,), jnp.float32, 0.1, 1.0)
    batch = jnp.concatenate([jnp.zeros(N // 2, jnp.int32),
                             jnp.ones(N - N // 2, jnp.int32)])

    out = gcnn_forward(x, edge_index, edge_attr, batch, params, num_graphs=G)
    out = jax.block_until_ready(out)
    assert out.shape == (G, 1) and out.dtype == jnp.float32
    assert bool(jnp.all(jnp.isfinite(out)))
    print("KERNEL_OK")
</pallas_src>

<mosaic_0001>
module attributes {stable_mosaic.version = 11 : i64} {
  func.func @graphconv_kernel(%arg0: i32, %arg1: memref<16x16xbf16, #tpu.memory_space<vmem>>, %arg2: memref<16x128xbf16, #tpu.memory_space<vmem>>, %arg3: memref<256x512xbf16, #tpu.memory_space<vmem>>, %arg4: memref<1x512xf32, #tpu.memory_space<vmem>>, %arg5: memref<16x512xbf16, #tpu.memory_space<vmem>>) attributes {dimension_semantics = [#tpu.dimension_semantics<parallel>], iteration_bounds = array<i64: 1>, scalar_prefetch = 0 : i64, scratch_operands = 0 : i64, tpu.core_type = #tpu.core_type<tc>, window_params = [{transform_indices = @transform_0, window_bounds = array<i64: 16, 16>}, {pipeline_mode = #tpu.pipeline_mode<synchronous>, transform_indices = @transform_1, window_bounds = array<i64: 16, 128>}, {pipeline_mode = #tpu.pipeline_mode<synchronous>, transform_indices = @transform_2, window_bounds = array<i64: 256, 512>}, {pipeline_mode = #tpu.pipeline_mode<synchronous>, transform_indices = @transform_3, window_bounds = array<i64: 1, 512>}, {transform_indices = @transform_4, window_bounds = array<i64: 16, 512>}]} {
    %c0 = arith.constant 0 : index
    %c0_0 = arith.constant 0 : index
    %0 = vector.load %arg1[%c0, %c0_0] : memref<16x16xbf16, #tpu.memory_space<vmem>>, vector<16x16xbf16>
    %c0_1 = arith.constant 0 : index
    %c0_2 = arith.constant 0 : index
    %1 = vector.load %arg2[%c0_1, %c0_2] : memref<16x128xbf16, #tpu.memory_space<vmem>>, vector<16x128xbf16>
    %cst = arith.constant dense<0.000000e+00> : vector<16x128xf32>
    %2 = tpu.matmul %0, %1, %cst {dimension_numbers = #tpu.dot_dimension_numbers<[1], [0], [0], [1], [0, 0, 1, 1], [], []>} : vector<16x16xbf16>, vector<16x128xbf16>, vector<16x128xf32> -> vector<16x128xf32>
    %c16_i32 = arith.constant 16 : i32
    %3 = arith.muli %arg0, %c16_i32 : i32
    %4 = tpu.assume_multiple %3, 16 : i32
    %5 = arith.index_cast %4 : i32 to index
    %c0_3 = arith.constant 0 : index
    %6 = vector.load %arg2[%5, %c0_3] : memref<16x128xbf16, #tpu.memory_space<vmem>>, vector<16x128xbf16>
    %7 = arith.truncf %2 : vector<16x128xf32> to vector<16x128xbf16>
    %8 = tpu.concatenate %7, %6 in 1 : vector<16x128xbf16>, vector<16x128xbf16> -> vector<16x256xbf16>
    %c0_4 = arith.constant 0 : index
    %c0_5 = arith.constant 0 : index
    %9 = vector.load %arg3[%c0_4, %c0_5] : memref<256x512xbf16, #tpu.memory_space<vmem>>, vector<256x512xbf16>
    %cst_6 = arith.constant dense<0.000000e+00> : vector<16x512xf32>
    %10 = tpu.matmul %8, %9, %cst_6 {dimension_numbers = #tpu.dot_dimension_numbers<[1], [0], [0], [1], [0, 0, 1, 1], [], []>} : vector<16x256xbf16>, vector<256x512xbf16>, vector<16x512xf32> -> vector<16x512xf32>
    %c0_7 = arith.constant 0 : index
    %c0_8 = arith.constant 0 : index
    %11 = vector.load %arg4[%c0_7, %c0_8] : memref<1x512xf32, #tpu.memory_space<vmem>>, vector<1x512xf32>
    %12 = vector.broadcast %11 : vector<1x512xf32> to vector<16x512xf32>
    %13 = arith.addf %10, %12 : vector<16x512xf32>
    %cst_9 = arith.constant 0.000000e+00 : f32
    %14 = vector.broadcast %cst_9 : f32 to vector<16x512xf32>
    %15 = arith.maximumf %13, %14 : vector<16x512xf32>
    %16 = arith.truncf %15 : vector<16x512xf32> to vector<16x512xbf16>
    %c0_10 = arith.constant 0 : index
    %c0_11 = arith.constant 0 : index
    %17 = vector.load %arg5[%c0_10, %c0_11] : memref<16x512xbf16, #tpu.memory_space<vmem>>, vector<16x512xbf16>
    tpu.vector_store %arg5[%c0_10, %c0_11], %16 {strides = array<i32>} : memref<16x512xbf16, #tpu.memory_space<vmem>>, vector<16x512xbf16>,
    return
  }
  func.func @transform_0(%arg0: i32) -> (i32, i32) {
    %c0_i32 = arith.constant 0 : i32
    %c0_i32_0 = arith.constant 0 : i32
    return %arg0, %c0_i32 : i32, i32
  }
  func.func @transform_1(%arg0: i32) -> (i32, i32) {
    %c0_i32 = arith.constant 0 : i32
    %c0_i32_0 = arith.constant 0 : i32
    %c0_i32_1 = arith.constant 0 : i32
    return %c0_i32, %c0_i32_0 : i32, i32
  }
  func.func @transform_2(%arg0: i32) -> (i32, i32) {
    %c0_i32 = arith.constant 0 : i32
    %c0_i32_0 = arith.constant 0 : i32
    %c0_i32_1 = arith.constant 0 : i32
    return %c0_i32, %c0_i32_0 : i32, i32
  }
  func.func @transform_3(%arg0: i32) -> (i32, i32) {
    %c0_i32 = arith.constant 0 : i32
    %c0_i32_0 = arith.constant 0 : i32
    %c0_i32_1 = arith.constant 0 : i32
    return %c0_i32, %c0_i32_0 : i32, i32
  }
  func.func @transform_4(%arg0: i32) -> (i32, i32) {
    %c0_i32 = arith.constant 0 : i32
    %c0_i32_0 = arith.constant 0 : i32
    return %arg0, %c0_i32 : i32, i32
  }
}

</mosaic_0001>

<bundles_post_ra>
// kernel: tpu_custom_call.1
= control target key start
LH: loop header
LB: loop body
LE: loop exit
PB: predicated region body
PF: predicated region fallthrough
CT: control target
= control target key end

     0   :  { %9 = vsyncpa [#allocation3], 0  ;;  %s1017_s0 = inlined_call_operand.hbm [shape: bf16[16,16], index: 0, kind: input, shape index: {}]   ;;  %s1018_s1 = inlined_call_operand.hbm [shape: bf16[16,128], index: 1, kind: input, shape index: {}]   ;;  %s1019_s2 = inlined_call_operand.hbm [shape: bf16[256,512], index: 2, kind: input, shape index: {}]   ;;  %s1020_s3 = inlined_call_operand.vmem [shape: f32[1,512], index: 3, kind: input, shape index: {}]   ;;  %s1021_s4 = inlined_call_operand.hbm [shape: bf16[16,512], index: 4, kind: output, shape index: {}]  }
   0x1   :  { %10 = vsyncpa [#allocation6], 0 }
   0x2   :  { %11 = vsyncpa [#allocation4], 0  ;;  %s961_s15 = smov [#allocation5]   ;;  %s962_s17 = smov [#allocation2]  }
   0x3   :  { %s29_s16 = sshll.u32 %s961_s15, 4  ;;  %s17_s18 = sshll.u32 %s962_s17, 4  ;;  %s30_s16 = int_to_ptr.vmem [resolvable:$true] %s29_s16  ;;  %s18_s18 = int_to_ptr.vmem [resolvable:$true] %s17_s18 }
   0x4   :  { %s883_s19 = scalar_lea.vmem %s30_s16, 128  ;;  %p888_p1 = scmp.lt.s32.totalorder %s30_s16, %s30_s16 }
   0x5   :  { %p884_p0 = scmp.ne.s32.totalorder %s30_s16, %s883_s19  ;;  %p889_p2 = scmp.lt.s32.totalorder %s883_s19, %s883_s19 }
   0x7   :  { %p890_p3 = por %p889_p2, %p888_p1 }
   0x9   :  { %p891_p4 = pnand %p890_p3, %p884_p0 }
   0xb   :  { %894 = shalt.err (!%p891_p4)
}
   0xc   :  { %s963_s20 = smov 64   ;;  %s964_s21 = smov 4  }
   0xd   :  { %35 = dma.hbm_to_vmem [thread:$0]  %s1018_s1, 128, %s30_s16, [#allocation6], %s963_s20, %s963_s20, %s964_s21  }
   0xe   :  { %s903_s24 = scalar_lea.vmem %s18_s18, 128  ;;  %p908_p6 = scmp.lt.s32.totalorder %s18_s18, %s18_s18 }
   0xf   :  { %p904_p5 = scmp.ne.s32.totalorder %s18_s18, %s903_s24  ;;  %p909_p7 = scmp.lt.s32.totalorder %s903_s24, %s903_s24 }
  0x11   :  { %p910_p8 = por %p909_p7, %p908_p6 }
  0x13   :  { %p911_p9 = pnand %p910_p8, %p904_p5 }
  0x15   :  { %914 = shalt.err (!%p911_p9)
}
  0x16   :  { %23 = dma.hbm_to_vmem [thread:$0]  %s1017_s0, 128, %s18_s18, [#allocation3], %s963_s20, %s963_s20, %s964_s21  }
  0x17   :  { %s965_s27 = smov [#allocation7]  }
  0x18   :  { %s41_s28 = sshll.u32 %s965_s27, 4  ;;  %s42_s28 = int_to_ptr.vmem [resolvable:$true] %s41_s28 }
  0x19   :  { %s923_s29 = scalar_lea.vmem %s42_s28, 8192  ;;  %p928_p11 = scmp.lt.s32.totalorder %s42_s28, %s42_s28 }
  0x1a   :  { %p924_p10 = scmp.ne.s32.totalorder %s42_s28, %s923_s29  ;;  %p929_p12 = scmp.lt.s32.totalorder %s923_s29, %s923_s29 }
  0x1c   :  { %p930_p13 = por %p929_p12, %p928_p11 }
  0x1e   :  { %p931_p0 = pnand %p930_p13, %p924_p10 }
  0x20   :  { %934 = shalt.err (!%p931_p0)
}
  0x21   :  { %s966_s1 = smov 256   ;;  %s967_s30 = smov 16  }
  0x22   :  { %47 = dma.hbm_to_vmem [thread:$0]  %s1019_s2, 8192, %s42_s28, [#allocation6], %s966_s1, %s966_s1, %s967_s30  }
  0x23   :  { %955 = dma.done.wait [#allocation3], 128  }
  0x24   :  { %956 = vsyncadd [#allocation3], 4294967168 }
  0x25   :  { %957 = dma.done.wait [#allocation6], 8320  }
  0x26   :  { %958 = vsyncadd [#allocation6], 4294958976  ;;  %v968_v0 = vmov 0.0   ;;  %vm969_vm0 = vmmov 0   ;;  %v776_v1 = vld [vmem:[#allocation5] sm:$0xff]   ;;  %v777_v2 = vld [vmem:[#allocation2] sm:$0xff]  }
  0x27   :  { %760 = vmatprep.subr.bf16.mxu0 %v968_v0  ;;  %762 = vmatprep.mubr.msk.bf16.mxu0 %vm969_vm0, %v968_v0  ;;  %vm75_vm1 = vcmask 130048   ;;  %v778_v3 = vld [vmem:[#allocation7 + $0xe4] ss:$16 sps:$4 sm:$0xff]   ;;  %v780_v4 = vld [vmem:[#allocation7 + $0xe8] ss:$16 sps:$4 sm:$0xff]  }
  0x28   :  { %761 = vmatpush3.bf16.msra.mxu0 %v776_v1  ;;  %540 = vmatprep.subr.bf16.mxu1 %v778_v3  ;;  %v782_v5 = vld [vmem:[#allocation7 + $0xec] ss:$16 sps:$4 sm:$0xff]   ;;  %v783_v6 = vld [vmem:[#allocation7 + $0xe0] ss:$16 sps:$4 sm:$0xff]   ;;  %v784_v7 = vld [vmem:[#allocation7 + $0xc4] ss:$16 sps:$4 sm:$0xff]  }
  0x29   :  { %583 = vmatprep.subr.bf16.mxu0 %v782_v5  ;;  %541 = vmatpush1.bf16.msra.mxu1 %v783_v6  ;;  %v786_v8 = vld [vmem:[#allocation7 + $0xc8] ss:$16 sps:$4 sm:$0xff]   ;;  %v788_v9 = vld [vmem:[#allocation7 + $0xcc] ss:$16 sps:$4 sm:$0xff]   ;;  %v789_v10 = vld [vmem:[#allocation7 + $0xc0] ss:$16 sps:$4 sm:$0xff]  }
  0x2a   :  { %542 = vmatprep.subr.bf16.mxu1 %v784_v7  ;;  %v790_v11 = vld [vmem:[#allocation7 + $0xa4] ss:$16 sps:$4 sm:$0xff]   ;;  %v792_v12 = vld [vmem:[#allocation7 + $0xa8] ss:$16 sps:$4 sm:$0xff]   ;;  %v794_v13 = vld [vmem:[#allocation7 + $0xac] ss:$16 sps:$4 sm:$0xff]  }
  0x2b   :  { %763 = vmatmul.mubr.msk.bf16.vlgmr.msra.gmra.mxu0 %vm75_vm1, %v777_v2  ;;  %v795_v14 = vld [vmem:[#allocation7 + $0xa0] ss:$16 sps:$4 sm:$0xff]   ;;  %v796_v15 = vld [vmem:[#allocation7 + $0x84] ss:$16 sps:$4 sm:$0xff]   ;;  %v800_v16 = vld [vmem:[#allocation7 + $0x8c] ss:$16 sps:$4 sm:$0xff]  }
  0x2c   :  { %584 = vmatpush1.bf16.msra.mxu0 %v780_v4  ;;  %v798_v17 = vld [vmem:[#allocation7 + $0x88] ss:$16 sps:$4 sm:$0xff]   ;;  %v801_v18 = vld [vmem:[#allocation7 + $0x80] ss:$16 sps:$4 sm:$0xff]   ;;  %v802_v19 = vld [vmem:[#allocation7 + $0x64] ss:$16 sps:$4 sm:$0xff]  }
  0x2d   :  { %585 = vmatprep.subr.bf16.mxu0 %v788_v9  ;;  %543 = vmatpush1.bf16.msra.mxu1 %v789_v10  ;;  %v806_v20 = vld [vmem:[#allocation7 + $0x6c] ss:$16 sps:$4 sm:$0xff]   ;;  %v804_v21 = vld [vmem:[#allocation7 + $0x68] ss:$16 sps:$4 sm:$0xff]   ;;  %v807_v22 = vld [vmem:[#allocation7 + $0x60] ss:$16 sps:$4 sm:$0xff]   ;;  %v200_v9 = vlaneseq }
  0x2e   :  { %544 = vmatprep.subr.bf16.mxu1 %v790_v11  ;;  %v808_v23 = vld [vmem:[#allocation7 + $0x44] ss:$16 sps:$4 sm:$0xff]   ;;  %v812_v24 = vld [vmem:[#allocation7 + $0x4c] ss:$16 sps:$4 sm:$0xff]   ;;  %v810_v25 = vld [vmem:[#allocation7 + $0x48] ss:$16 sps:$4 sm:$0xff]  }
  0x2f   :  { %v813_v26 = vld [vmem:[#allocation7 + $0x40] ss:$16 sps:$4 sm:$0xff]   ;;  %v814_v27 = vld [vmem:[#allocation7 + $0x24] ss:$16 sps:$4 sm:$0xff]   ;;  %v818_v28 = vld [vmem:[#allocation7 + $0x2c] ss:$16 sps:$4 sm:$0xff]  }
  0x30   :  { %586 = vmatpush1.bf16.msra.mxu0 %v786_v8  ;;  %v816_v29 = vld [vmem:[#allocation7 + $0x28] ss:$16 sps:$4 sm:$0xff]   ;;  %v819_v30 = vld [vmem:[#allocation7 + $0x20] ss:$16 sps:$4 sm:$0xff]   ;;  %v820_v31 = vld [vmem:[#allocation7 + $0x4] ss:$16 sps:$4 sm:$0xff]  }
  0x31   :  { %587 = vmatprep.subr.bf16.mxu0 %v794_v13  ;;  %545 = vmatpush1.bf16.msra.mxu1 %v795_v14  ;;  %v824_v32 = vld [vmem:[#allocation7 + $0xc] ss:$16 sps:$4 sm:$0xff]   ;;  %v822_v33 = vld [vmem:[#allocation7 + $0x8] ss:$16 sps:$4 sm:$0xff]   ;;  %v825_v34 = vld [vmem:[#allocation7] ss:$16 sps:$4 sm:$0xff]  }
  0x32   :  { %546 = vmatprep.subr.bf16.mxu1 %v796_v15  ;;  %v826_v35 = vld [vmem:[#allocation7 + $0x1e4] ss:$16 sps:$4 sm:$0xff]   ;;  %v830_v36 = vld [vmem:[#allocation7 + $0x1ec] ss:$16 sps:$4 sm:$0xff]   ;;  %v828_v37 = vld [vmem:[#allocation7 + $0x1e8] ss:$16 sps:$4 sm:$0xff]  }
  0x33   :  { %v831_v38 = vld [vmem:[#allocation7 + $0x1e0] ss:$16 sps:$4 sm:$0xff]   ;;  %v832_v39 = vld [vmem:[#allocation7 + $0x1c4] ss:$16 sps:$4 sm:$0xff]   ;;  %v836_v40 = vld [vmem:[#allocation7 + $0x1cc] ss:$16 sps:$4 sm:$0xff]  }
  0x34   :  { %588 = vmatpush1.bf16.msra.mxu0 %v792_v12  ;;  %v834_v41 = vld [vmem:[#allocation7 + $0x1c8] ss:$16 sps:$4 sm:$0xff]   ;;  %v837_v42 = vld [vmem:[#allocation7 + $0x1c0] ss:$16 sps:$4 sm:$0xff]   ;;  %v838_v43 = vld [vmem:[#allocation7 + $0x1a4] ss:$16 sps:$4 sm:$0xff]  }
  0x35   :  { %589 = vmatprep.subr.bf16.mxu0 %v800_v16  ;;  %547 = vmatpush1.bf16.msra.mxu1 %v801_v18  ;;  %v842_v44 = vld [vmem:[#allocation7 + $0x1ac] ss:$16 sps:$4 sm:$0xff]   ;;  %v840_v45 = vld [vmem:[#allocation7 + $0x1a8] ss:$16 sps:$4 sm:$0xff]   ;;  %v843_v46 = vld [vmem:[#allocation7 + $0x1a0] ss:$16 sps:$4 sm:$0xff]  }
  0x36   :  { %548 = vmatprep.subr.bf16.mxu1 %v802_v19  ;;  %v844_v47 = vld [vmem:[#allocation7 + $0x184] ss:$16 sps:$4 sm:$0xff]   ;;  %v848_v48 = vld [vmem:[#allocation7 + $0x18c] ss:$16 sps:$4 sm:$0xff]   ;;  %v849_v49 = vld [vmem:[#allocation7 + $0x180] ss:$16 sps:$4 sm:$0xff]  }
  0x37   :  { %v846_v50 = vld [vmem:[#allocation7 + $0x188] ss:$16 sps:$4 sm:$0xff]   ;;  %v850_v51 = vld [vmem:[#allocation7 + $0x164] ss:$16 sps:$4 sm:$0xff]   ;;  %v854_v52 = vld [vmem:[#allocation7 + $0x16c] ss:$16 sps:$4 sm:$0xff]  }
  0x38   :  { %590 = vmatpush1.bf16.msra.mxu0 %v798_v17  ;;  %v855_v53 = vld [vmem:[#allocation7 + $0x160] ss:$16 sps:$4 sm:$0xff]   ;;  %v852_v54 = vld [vmem:[#allocation7 + $0x168] ss:$16 sps:$4 sm:$0xff]   ;;  %v856_v55 = vld [vmem:[#allocation7 + $0x144] ss:$16 sps:$4 sm:$0xff]  }
  0x39   :  { %591 = vmatprep.subr.bf16.mxu0 %v806_v20  ;;  %549 = vmatpush1.bf16.msra.mxu1 %v807_v22  ;;  %v860_v56 = vld [vmem:[#allocation7 + $0x14c] ss:$16 sps:$4 sm:$0xff]   ;;  %v861_v57 = vld [vmem:[#allocation7 + $0x140] ss:$16 sps:$4 sm:$0xff]   ;;  %v858_v58 = vld [vmem:[#allocation7 + $0x148] ss:$16 sps:$4 sm:$0xff]  }
  0x3a   :  { %550 = vmatprep.subr.bf16.mxu1 %v808_v23  ;;  %v862_v59 = vld [vmem:[#allocation7 + $0x124] ss:$16 sps:$4 sm:$0xff]   ;;  %v866_v60 = vld [vmem:[#allocation7 + $0x12c] ss:$16 sps:$4 sm:$0xff]   ;;  %v864_v61 = vld [vmem:[#allocation7 + $0x128] ss:$16 sps:$4 sm:$0xff]  }
  0x3b   :  { %v867_v62 = vld [vmem:[#allocation7 + $0x120] ss:$16 sps:$4 sm:$0xff]   ;;  %v868_v63 = vld [vmem:[#allocation7 + $0x104] ss:$16 sps:$4 sm:$0xff]   ;;  %v872_v0 = vld [vmem:[#allocation7 + $0x10c] ss:$16 sps:$4 sm:$0xff]  }
  0x3c   :  { %592 = vmatpush1.bf16.msra.mxu0 %v804_v21  ;;  %v870_v1 = vld [vmem:[#allocation7 + $0x108] ss:$16 sps:$4 sm:$0xff]   ;;  %v873_v2 = vld [vmem:[#allocation7 + $0x100] ss:$16 sps:$4 sm:$0xff]   ;;  %v201_v10 = vshrl.u32 %v200_v9, 7 }
  0x3d   :  { %593 = vmatprep.subr.bf16.mxu0 %v812_v24  ;;  %551 = vmatpush1.bf16.msra.mxu1 %v813_v26  ;;  %v874_v3 = vld [vmem:[#allocation5] sm:$0xff]   ;;  %v198_v13 = vld [vmem:[%s1020_s3] sm:$0xf]  ;;  %s970_s3 = smov [#allocation8]  }
  0x3e   :  { %552 = vmatprep.subr.bf16.mxu1 %v814_v27  ;;  %572 = vmatprep.mubr.bf16.mxu1 %v874_v3  ;;  %v202_v11 = vsub.s32 0, %v201_v10  ;;  %v210_v12 = vsub.s32 2, %v201_v10  ;;  %v206_v14 = vsub.s32 1, %v201_v10  ;;  %v214_v15 = vsub.s32 3, %v201_v10  ;;  %s667_s7 = sshll.u32 %s970_s3, 4  ;;  %s668_s7 = int_to_ptr.vmem [resolvable:$true] %s667_s7 }
  0x3f   :  { %615 = vmatprep.mubr.bf16.mxu0 %v874_v3  ;;  %s935_s8 = scalar_lea.vmem %s668_s7, 512  ;;  %p940_p2 = scmp.lt.s32.totalorder %s668_s7, %s668_s7 }
  0x40   :  { %594 = vmatpush1.bf16.msra.mxu0 %v810_v25  ;;  %v203_v16 = vrot.slane %v198_v13, %v202_v11  ;;  %v211_v17 = vrot.slane %v198_v13, %v210_v12  ;;  %v207_v18 = vrot.slane %v198_v13, %v206_v14  ;;  %v215_v19 = vrot.slane %v198_v13, %v214_v15  ;;  %p936_p1 = scmp.ne.s32.totalorder %s668_s7, %s935_s8  ;;  %p941_p3 = scmp.lt.s32.totalorder %s935_s8, %s935_s8 }
  0x41   :  { %595 = vmatprep.subr.bf16.mxu0 %v818_v28  ;;  %553 = vmatpush1.bf16.msra.mxu1 %v819_v30 }
  0x42   :  { %554 = vmatprep.subr.bf16.mxu1 %v820_v31  ;;  %p942_p4 = por %p941_p3, %p940_p2 }
  0x44   :  { %596 = vmatpush1.bf16.msra.mxu0 %v816_v29  ;;  %p943_p5 = pnand %p942_p4, %p936_p1 }
  0x45   :  { %597 = vmatprep.subr.bf16.mxu0 %v824_v32  ;;  %555 = vmatpush1.bf16.msra.mxu1 %v825_v34 }
  0x46   :  { %556 = vmatprep.subr.bf16.mxu1 %v826_v35 }
  0x48   :  { %598 = vmatpush1.bf16.msra.mxu0 %v822_v33 }
  0x49   :  { %599 = vmatprep.subr.bf16.mxu0 %v830_v36  ;;  %557 = vmatpush2.bf16.msra.mxu1 %v831_v38 }
  0x4a   :  { %558 = vmatprep.subr.bf16.mxu1 %v832_v39 }
  0x4c   :  { %600 = vmatpush2.bf16.msra.mxu0 %v828_v37 }
  0x4d   :  { %601 = vmatprep.subr.bf16.mxu0 %v836_v40  ;;  %559 = vmatpush2.bf16.msra.mxu1 %v837_v42 }
  0x4e   :  { %560 = vmatprep.subr.bf16.mxu1 %v838_v43 }
  0x50   :  { %602 = vmatpush2.bf16.msra.mxu0 %v834_v41 }
  0x51   :  { %603 = vmatprep.subr.bf16.mxu0 %v842_v44  ;;  %561 = vmatpush2.bf16.msra.mxu1 %v843_v46 }
  0x52   :  { %562 = vmatprep.subr.bf16.mxu1 %v844_v47 }
  0x54   :  { %604 = vmatpush2.bf16.msra.mxu0 %v840_v45 }
  0x55   :  { %605 = vmatprep.subr.bf16.mxu0 %v848_v48  ;;  %563 = vmatpush2.bf16.msra.mxu1 %v849_v49 }
  0x56   :  { %564 = vmatprep.subr.bf16.mxu1 %v850_v51 }
  0x58   :  { %606 = vmatpush2.bf16.msra.mxu0 %v846_v50 }
  0x59   :  { %607 = vmatprep.subr.bf16.mxu0 %v854_v52  ;;  %565 = vmatpush2.bf16.msra.mxu1 %v855_v53 }
  0x5a   :  { %566 = vmatprep.subr.bf16.mxu1 %v856_v55 }
  0x5c   :  { %608 = vmatpush2.bf16.msra.mxu0 %v852_v54 }
  0x5d   :  { %609 = vmatprep.subr.bf16.mxu0 %v860_v56  ;;  %567 = vmatpush2.bf16.msra.mxu1 %v861_v57 }
  0x5e   :  { %568 = vmatprep.subr.bf16.mxu1 %v862_v59 }
  0x60   :  { %610 = vmatpush2.bf16.msra.mxu0 %v858_v58 }
  0x61   :  { %611 = vmatprep.subr.bf16.mxu0 %v866_v60  ;;  %569 = vmatpush2.bf16.msra.mxu1 %v867_v62 }
  0x62   :  { %570 = vmatprep.subr.bf16.mxu1 %v868_v63 }
  0x64   :  { %612 = vmatpush2.bf16.msra.mxu0 %v864_v61 }
  0x65   :  { %613 = vmatprep.subr.bf16.mxu0 %v872_v0  ;;  %571 = vmatpush2.bf16.msra.mxu1 %v873_v2 }
  0x68   :  { %614 = vmatpush2.bf16.msra.mxu0 %v870_v1 }
  0xeb   :  { %v113_v4 = vpop.f32.mrf.mxu0 }
  0xed   :  { %v764_v5 = vpop.f32.mrf.mxu0 }
  0xef   :  { %v116_v6 = vpop.f32.mrf.mxu0 }
  0xf0   :  { %v127_v7 = vpack.c.bf16 %v116_v6, %v113_v4 }
  0xf1   :  { %v765_v8 = vpop.f32.mrf.mxu0 }
  0xf2   :  { %573 = vmatmul.mubr.bf16.vlgmr.msra.gmra.mxu1 %v127_v7  ;;  %616 = vmatmul.mubr.bf16.vlgmr.msra.gmra.mxu0 %v127_v7 }
 0x1b2   :  { %v574_v20 = vpop.f32.mrf.mxu1  ;;  %v617_v21 = vpop.f32.mrf.mxu0 }
 0x1b3   :  { %v575_v22 = vadd.f32 %v574_v20, %v203_v16  ;;  %v618_v23 = vadd.f32 %v617_v21, %v211_v17 }
 0x1b4   :  { %v576_v24 = vpop.f32.mrf.mxu1  ;;  %v619_v25 = vpop.f32.mrf.mxu0 }
 0x1b5   :  { %v577_v26 = vadd.f32 %v576_v24, %v207_v18  ;;  %v620_v27 = vadd.f32 %v619_v25, %v215_v19  ;;  %v626_v30 = vmax.f32 %v575_v22, 0.0  ;;  %v628_v31 = vmax.f32 %v618_v23, 0.0 }
 0x1b6   :  { %v578_v28 = vpop.f32.mrf.mxu1  ;;  %v621_v29 = vpop.f32.mrf.mxu0 }
 0x1b7   :  { %v627_v32 = vmax.f32 %v577_v26, 0.0  ;;  %v629_v33 = vmax.f32 %v620_v27, 0.0  ;;  %v579_v34 = vadd.f32 %v578_v28, %v203_v16  ;;  %v622_v35 = vadd.f32 %v621_v29, %v211_v17 }
 0x1b8   :  { %v580_v36 = vpop.f32.mrf.mxu1  ;;  %v623_v37 = vpop.f32.mrf.mxu0 }
 0x1b9   :  { %v754_v38 = vpack.c.bf16 %v627_v32, %v626_v30  ;;  %v755_v39 = vpack.c.bf16 %v629_v33, %v628_v31  ;;  %v581_v40 = vadd.f32 %v580_v36, %v207_v18  ;;  %v624_v41 = vadd.f32 %v623_v37, %v215_v19 }
 0x1ba   :  { %v630_v42 = vmax.f32 %v579_v34, 0.0  ;;  %v632_v43 = vmax.f32 %v622_v35, 0.0 }
 0x1bb   :  { %658 = vst [vmem:[#allocation8] sm:$0xff] %v754_v38  ;;  %659 = vst [vmem:[#allocation8 + $0x8] sm:$0xff] %v755_v39  ;;  %v631_v44 = vmax.f32 %v581_v40, 0.0  ;;  %v633_v45 = vmax.f32 %v624_v41, 0.0 }
 0x1bd   :  { %v756_v46 = vpack.c.bf16 %v631_v44, %v630_v42  ;;  %v757_v47 = vpack.c.bf16 %v633_v45, %v632_v43 }
 0x1bf   :  { %660 = vst [vmem:[#allocation8 + $0x10] sm:$0xff] %v756_v46  ;;  %661 = vst [vmem:[#allocation8 + $0x18] sm:$0xff] %v757_v47 }
 0x1c0   :  { %946 = shalt.err (!%p943_p5)
}
 0x1c1   :  { %673 = dma.vmem_to_hbm [thread:$0]  %s668_s7, 512, %s1021_s4, [#allocation4], %s966_s1, %s966_s1, %s967_s30  }
 0x1c2   :  { %959 = dma.done.wait [#allocation4], 512  }
 0x1c3   :  { %960 = vsyncadd [#allocation4], 4294966784 }
 0x1c4   :  { %677 = vsyncpa [#allocation3], 1 }
 0x1c5   :  { %678 = vsyncpa [#allocation6], 1 }
 0x1c6   :  { %679 = vsyncpa [#allocation4], 1 }

</bundles_post_ra>
